<compile_context>
chip_gen: v5e
topology: v5e:2x2
jax: 0.10.0
libtpu: 0.0.40
codegen_flags: <defaults>
</compile_context>

<pallas_src>
import jax
import jax.numpy as jnp
from jax.experimental import pallas as pl
from jax.experimental.pallas import tpu as pltpu

N_EMBD = 24
N_HEAD = 3
HEAD_SIZE = N_EMBD // N_HEAD
BLOCK_SIZE = 3  # max sequence length (tril buffer size)
LN_EPS = 1e-5

# ---- packed parameter-slab layout (row offsets; lane width = 4*N_EMBD = 96) ------------
LANES  = 4 * N_EMBD                 # 96
R_QKV  = 0                          # rows [0,24):    (C, 3C)  [Wq*scale | Wk | Wv]
R_PROJ = R_QKV  + N_EMBD            # rows [24,48):   (C, C)   output projection
R_FF1  = R_PROJ + N_EMBD            # rows [48,72):   (C, 4C)
R_FF2  = R_FF1  + N_EMBD            # rows [72,168):  (4C, C)
R_VEC  = R_FF2  + 4 * N_EMBD        # rows [168,176): bproj,g1,b1,bff2,g2,b2,bff1,pad
R_MASK = R_VEC  + 8                 # rows [176,176+BT): (BT, BT) additive mask


def _layer_norm(z, gamma, beta):
    # z: (BT, C); gamma/beta: (1, C)
    mu = jnp.mean(z, axis=-1, keepdims=True)
    var = jnp.mean((z - mu) ** 2, axis=-1, keepdims=True)
    return (z - mu) * jax.lax.rsqrt(var + LN_EPS) * gamma + beta


def block_kernel(x_ref, p_ref, out_ref):
    x = x_ref[...]                                           # (BT, C)
    BT, C = x.shape
    hs = HEAD_SIZE

    # Static, tile-aligned slices of the packed parameter slab (cheap masked loads).
    wqkv = p_ref[R_QKV:R_QKV + C, 0:3 * C]                   # (C, 3C)
    wff1 = p_ref[R_FF1:R_FF1 + C, 0:4 * C]                   # (C, 4C)
    wff2 = p_ref[R_FF2:R_FF2 + 4 * C, 0:C]                   # (4C, C)
    vecs = p_ref[R_VEC:R_VEC + 8, 0:4 * C]                   # (8, 4C)
    mask = p_ref[R_MASK:R_MASK + BT, 0:BT]                   # (BT, BT) additive bias

    bproj = vecs[0:1, 0:C]
    g1, b1 = vecs[1:2, 0:C], vecs[2:3, 0:C]
    bff2 = vecs[3:4, 0:C]
    g2, b2 = vecs[4:5, 0:C], vecs[5:6, 0:C]
    bff1 = vecs[6:7, 0:4 * C]

    # --- fused QKV projection: one MXU dot on the whole flattened slab ---------------------
    qkv = jnp.dot(x, wqkv, preferred_element_type=jnp.float32)   # (BT, 3C); Q pre-scaled

    # --- attention: tiny n_head loop; batch handled by the block-diagonal causal mask ------
    sa = None
    for h in range(N_HEAD):
        q = qkv[:, h * hs:(h + 1) * hs]                       # (BT, hs)
        k = qkv[:, C + h * hs:C + (h + 1) * hs]               # (BT, hs)
        v = qkv[:, 2 * C + h * hs:2 * C + (h + 1) * hs]       # (BT, hs)

        # q @ k^T without an explicit transpose (contract last axes).
        s = jax.lax.dot_general(
            q, k, (((1,), (1,)), ((), ())),
            preferred_element_type=jnp.float32) + mask         # (BT, BT)

        s = s - jnp.max(s, axis=-1, keepdims=True)
        p = jnp.exp(s)
        p = p * pl.reciprocal(jnp.sum(p, axis=-1, keepdims=True), approx=True)
        # dropout(p) is identity in eval mode

        head = jnp.dot(p, v, preferred_element_type=jnp.float32)          # (BT, hs)
        # concat(head_0..head_{H-1}) @ Wproj  ==  sum_h head_h @ Wproj[h*hs:(h+1)*hs]
        wp = p_ref[R_PROJ + h * hs:R_PROJ + (h + 1) * hs, 0:C]            # (hs, C)
        part = jnp.dot(head, wp, preferred_element_type=jnp.float32)      # (BT, C)
        sa = part if sa is None else sa + part
    sa = sa + bproj
    # dropout(sa) is identity in eval mode

    # --- residual + LN1 + FFN + residual + LN2, all once on the flat slab -------------------
    x1 = _layer_norm(x + sa, g1, b1)                                       # (BT, C)
    h1 = jnp.dot(x1, wff1, preferred_element_type=jnp.float32) + bff1      # (BT, 4C)
    h1 = jnp.maximum(h1, 0.0)
    ff = jnp.dot(h1, wff2, preferred_element_type=jnp.float32) + bff2      # (BT, C)
    # dropout(ff) is identity in eval mode

    out_ref[...] = _layer_norm(x1 + ff, g2, b2)                            # single store


def prepare_params(params, B, T):
    """One-time packing of all Block parameters (+ block-diagonal causal mask) into a
    single f32 slab so the kernel needs exactly one parameter DMA per call."""
    C = N_EMBD
    BT = B * T
    scale = 1.0 / (HEAD_SIZE ** 0.5)

    def heads_to_cols(w):  # (n_head, C, hs) -> (C, n_head*hs)
        return jnp.transpose(w, (1, 0, 2)).reshape(C, N_HEAD * HEAD_SIZE)

    def pad_cols(a):
        return jnp.pad(a, ((0, 0), (0, LANES - a.shape[1])))

    # Fuse q/k/v and fold the attention scale into the query block.
    wqkv = jnp.concatenate(
        [heads_to_cols(params["wq"]) * scale,
         heads_to_cols(params["wk"]),
         heads_to_cols(params["wv"])], axis=1)                           # (C, 3C)

    small = jnp.concatenate(
        [params["bproj"], params["g1"], params["b1"],
         params["bff2"], params["g2"], params["b2"]], axis=0)            # (6, C)
    vec_block = jnp.concatenate(
        [pad_cols(small), pad_cols(params["bff1"]),
         jnp.zeros((1, LANES), jnp.float32)], axis=0)                    # (8, 4C)

    # Block-diagonal causal mask over the flattened (B*T, B*T) score matrix:
    # allowed iff same batch and key index <= query index.
    idx = jnp.arange(BT)
    allowed = ((idx[:, None] // T) == (idx[None, :] // T)) & (idx[None, :] <= idx[:, None])
    mask_bias = jnp.where(allowed, 0.0, -1e30).astype(jnp.float32)       # (BT, BT)

    slab = jnp.concatenate(
        [pad_cols(wqkv),            # rows [0, 24)
         pad_cols(params["wproj"]), # rows [24, 48)
         pad_cols(params["wff1"]),  # rows [48, 72)
         pad_cols(params["wff2"]),  # rows [72, 168)
         vec_block,                 # rows [168, 176)
         pad_cols(mask_bias)],      # rows [176, 176+BT)
        axis=0)
    return slab                                                          # (176+BT, 96)


def block_forward(x, packed_params):
    B, T, C = x.shape
    BT = B * T
    x_flat = x.reshape(BT, C)

    vmem = pltpu.MemorySpace.VMEM
    out_flat = pl.pallas_call(
        block_kernel,
        out_shape=jax.ShapeDtypeStruct((BT, C), jnp.float32),
        in_specs=[pl.BlockSpec(memory_space=vmem),
                  pl.BlockSpec(memory_space=vmem)],
        out_specs=pl.BlockSpec(memory_space=vmem),
    )(x_flat, packed_params)
    return out_flat.reshape(B, T, C)


def block_reference(x, p):
    """Pure-JAX reference mirroring the (intended) PyTorch forward, eval mode."""
    B, T, C = x.shape
    causal = jnp.tril(jnp.ones((T, T), dtype=bool))
    scale = 1.0 / (HEAD_SIZE ** 0.5)

    heads = []
    for h in range(N_HEAD):
        q = jnp.einsum("btc,cd->btd", x, p["wq"][h])
        k = jnp.einsum("btc,cd->btd", x, p["wk"][h])
        v = jnp.einsum("btc,cd->btd", x, p["wv"][h])
        s = jnp.einsum("btd,bsd->bts", q, k) * scale
        s = jnp.where(causal[None], s, -jnp.inf)
        w = jax.nn.softmax(s, axis=-1)
        heads.append(jnp.einsum("bts,bsd->btd", w, v))
    sa = jnp.concatenate(heads, axis=-1)
    sa = jnp.einsum("btc,cd->btd", sa, p["wproj"]) + p["bproj"][0]

    def ln(z, g, b):
        mu = jnp.mean(z, axis=-1, keepdims=True)
        var = jnp.mean((z - mu) ** 2, axis=-1, keepdims=True)
        return (z - mu) / jnp.sqrt(var + LN_EPS) * g[0] + b[0]

    x1 = ln(x + sa, p["g1"], p["b1"])
    hdd = jax.nn.relu(jnp.einsum("btc,cf->btf", x1, p["wff1"]) + p["bff1"][0])
    ff = jnp.einsum("btf,fc->btc", hdd, p["wff2"]) + p["bff2"][0]
    return ln(x1 + ff, p["g2"], p["b2"])


def init_params(key):
    ks = jax.random.split(key, 10)
    f32 = jnp.float32
    return {
        "wq": 0.05 * jax.random.normal(ks[0], (N_HEAD, N_EMBD, HEAD_SIZE), f32),
        "wk": 0.05 * jax.random.normal(ks[1], (N_HEAD, N_EMBD, HEAD_SIZE), f32),
        "wv": 0.05 * jax.random.normal(ks[2], (N_HEAD, N_EMBD, HEAD_SIZE), f32),
        "wproj": 0.05 * jax.random.normal(ks[3], (N_EMBD, N_EMBD), f32),
        "bproj": 0.01 * jax.random.normal(ks[4], (1, N_EMBD), f32),
        "g1": jnp.ones((1, N_EMBD), f32) + 0.1 * jax.random.normal(ks[5], (1, N_EMBD), f32),
        "b1": 0.1 * jax.random.normal(ks[6], (1, N_EMBD), f32),
        "wff1": 0.05 * jax.random.normal(ks[7], (N_EMBD, 4 * N_EMBD), f32),
        "bff1": jnp.zeros((1, 4 * N_EMBD), f32),
        "wff2": 0.05 * jax.random.normal(ks[8], (4 * N_EMBD, N_EMBD), f32),
        "bff2": jnp.zeros((1, N_EMBD), f32),
        "g2": jnp.ones((1, N_EMBD), f32),
        "b2": 0.1 * jax.random.normal(ks[9], (1, N_EMBD), f32),
    }


if __name__ == "__main__":
    key = jax.random.PRNGKey(0)
    k_x, k_p = jax.random.split(key)

    B, T = 2, BLOCK_SIZE  # T must be <= block_size (=3)
    x = jax.random.normal(k_x, (B, T, N_EMBD), jnp.float32)
    params = init_params(k_p)

    packed = jax.block_until_ready(prepare_params(params, B, T))  # one-time packing
    out = jax.block_until_ready(block_forward(x, packed))
    ref = jax.block_until_ready(block_reference(x, params))

    assert out.shape == (B, T, N_EMBD), out.shape
    assert jnp.all(jnp.isfinite(out)), "non-finite output"
    # Slightly looser tolerance than pure-f32: the softmax denominator uses the EUP
    # approximate reciprocal (relative error ~2^-12), negligible vs. these bounds.
    assert jnp.allclose(out, ref, atol=2e-3, rtol=2e-3), (
        f"max abs err {jnp.max(jnp.abs(out - ref))}"
    )
    print("KERNEL_OK")
</pallas_src>

<mosaic_0001>
module attributes {stable_mosaic.version = 11 : i64} {
  func.func @block_kernel(%arg0: memref<6x24xf32, #tpu.memory_space<vmem>>, %arg1: memref<182x96xf32, #tpu.memory_space<vmem>>, %arg2: memref<6x24xf32, #tpu.memory_space<vmem>>) attributes {dimension_semantics = [], scalar_prefetch = 0 : i64, scratch_operands = 0 : i64, tpu.core_type = #tpu.core_type<tc>} {
    %c0 = arith.constant 0 : index
    %c0_0 = arith.constant 0 : index
    %0 = vector.load %arg0[%c0, %c0_0] : memref<6x24xf32, #tpu.memory_space<vmem>>, vector<6x24xf32>
    %c0_1 = arith.constant 0 : index
    %c0_2 = arith.constant 0 : index
    %1 = vector.load %arg1[%c0_1, %c0_2] : memref<182x96xf32, #tpu.memory_space<vmem>>, vector<24x72xf32>
    %c48 = arith.constant 48 : index
    %c0_3 = arith.constant 0 : index
    %2 = vector.load %arg1[%c48, %c0_3] : memref<182x96xf32, #tpu.memory_space<vmem>>, vector<24x96xf32>
    %c72 = arith.constant 72 : index
    %c0_4 = arith.constant 0 : index
    %3 = vector.load %arg1[%c72, %c0_4] : memref<182x96xf32, #tpu.memory_space<vmem>>, vector<96x24xf32>
    %c168 = arith.constant 168 : index
    %c0_5 = arith.constant 0 : index
    %4 = vector.load %arg1[%c168, %c0_5] : memref<182x96xf32, #tpu.memory_space<vmem>>, vector<8x96xf32>
    %c176 = arith.constant 176 : index
    %c0_6 = arith.constant 0 : index
    %5 = vector.load %arg1[%c176, %c0_6] : memref<182x96xf32, #tpu.memory_space<vmem>>, vector<6x6xf32>
    %6 = vector.extract_strided_slice %4 {offsets = [0, 0], sizes = [1, 24], strides = [1, 1]} : vector<8x96xf32> to vector<1x24xf32>
    %7 = vector.extract_strided_slice %4 {offsets = [1, 0], sizes = [1, 24], strides = [1, 1]} : vector<8x96xf32> to vector<1x24xf32>
    %8 = vector.extract_strided_slice %4 {offsets = [2, 0], sizes = [1, 24], strides = [1, 1]} : vector<8x96xf32> to vector<1x24xf32>
    %9 = vector.extract_strided_slice %4 {offsets = [3, 0], sizes = [1, 24], strides = [1, 1]} : vector<8x96xf32> to vector<1x24xf32>
    %10 = vector.extract_strided_slice %4 {offsets = [4, 0], sizes = [1, 24], strides = [1, 1]} : vector<8x96xf32> to vector<1x24xf32>
    %11 = vector.extract_strided_slice %4 {offsets = [5, 0], sizes = [1, 24], strides = [1, 1]} : vector<8x96xf32> to vector<1x24xf32>
    %12 = vector.extract_strided_slice %4 {offsets = [6, 0], sizes = [1, 96], strides = [1, 1]} : vector<8x96xf32> to vector<1x96xf32>
    %cst = arith.constant dense<0.000000e+00> : vector<6x72xf32>
    %13 = tpu.matmul %0, %1, %cst {dimension_numbers = #tpu.dot_dimension_numbers<[1], [0], [0], [1], [0, 0, 1, 1], [], []>} : vector<6x24xf32>, vector<24x72xf32>, vector<6x72xf32> -> vector<6x72xf32>
    %14 = vector.extract_strided_slice %13 {offsets = [0, 0], sizes = [6, 8], strides = [1, 1]} : vector<6x72xf32> to vector<6x8xf32>
    %15 = vector.extract_strided_slice %13 {offsets = [0, 24], sizes = [6, 8], strides = [1, 1]} : vector<6x72xf32> to vector<6x8xf32>
    %16 = vector.extract_strided_slice %13 {offsets = [0, 48], sizes = [6, 8], strides = [1, 1]} : vector<6x72xf32> to vector<6x8xf32>
    %cst_7 = arith.constant dense<0.000000e+00> : vector<6x6xf32>
    %17 = tpu.matmul %14, %15, %cst_7 {dimension_numbers = #tpu.dot_dimension_numbers<[1], [1], [0], [0], [0, 0, 1, 0], [], []>} : vector<6x8xf32>, vector<6x8xf32>, vector<6x6xf32> -> vector<6x6xf32>
    %18 = arith.addf %17, %5 : vector<6x6xf32>
    %cst_8 = arith.constant dense<0xFF800000> : vector<6xf32>
    %19 = vector.multi_reduction <maximumf>, %18, %cst_8 [1] : vector<6x6xf32> to vector<6xf32>
    %20 = vector.shape_cast %19 : vector<6xf32> to vector<6x1xf32>
    %21 = vector.broadcast %20 : vector<6x1xf32> to vector<6x6xf32>
    %22 = arith.subf %18, %21 : vector<6x6xf32>
    %23 = math.exp %22 : vector<6x6xf32>
    %cst_9 = arith.constant dense<0.000000e+00> : vector<6xf32>
    %24 = vector.multi_reduction <add>, %23, %cst_9 [1] : vector<6x6xf32> to vector<6xf32>
    %25 = vector.shape_cast %24 : vector<6xf32> to vector<6x1xf32>
    %26 = tpu.reciprocal %25 {approx = true} : vector<6x1xf32> -> vector<6x1xf32>
    %27 = vector.broadcast %26 : vector<6x1xf32> to vector<6x6xf32>
    %28 = arith.mulf %23, %27 : vector<6x6xf32>
    %cst_10 = arith.constant dense<0.000000e+00> : vector<6x8xf32>
    %29 = tpu.matmul %28, %16, %cst_10 {dimension_numbers = #tpu.dot_dimension_numbers<[1], [0], [0], [1], [0, 0, 1, 1], [], []>} : vector<6x6xf32>, vector<6x8xf32>, vector<6x8xf32> -> vector<6x8xf32>
    %c24 = arith.constant 24 : index
    %c0_11 = arith.constant 0 : index
    %30 = vector.load %arg1[%c24, %c0_11] : memref<182x96xf32, #tpu.memory_space<vmem>>, vector<8x24xf32>
    %cst_12 = arith.constant dense<0.000000e+00> : vector<6x24xf32>
    %31 = tpu.matmul %29, %30, %cst_12 {dimension_numbers = #tpu.dot_dimension_numbers<[1], [0], [0], [1], [0, 0, 1, 1], [], []>} : vector<6x8xf32>, vector<8x24xf32>, vector<6x24xf32> -> vector<6x24xf32>
    %32 = vector.extract_strided_slice %13 {offsets = [0, 8], sizes = [6, 8], strides = [1, 1]} : vector<6x72xf32> to vector<6x8xf32>
    %33 = vector.extract_strided_slice %13 {offsets = [0, 32], sizes = [6, 8], strides = [1, 1]} : vector<6x72xf32> to vector<6x8xf32>
    %34 = vector.extract_strided_slice %13 {offsets = [0, 56], sizes = [6, 8], strides = [1, 1]} : vector<6x72xf32> to vector<6x8xf32>
    %cst_13 = arith.constant dense<0.000000e+00> : vector<6x6xf32>
    %35 = tpu.matmul %32, %33, %cst_13 {dimension_numbers = #tpu.dot_dimension_numbers<[1], [1], [0], [0], [0, 0, 1, 0], [], []>} : vector<6x8xf32>, vector<6x8xf32>, vector<6x6xf32> -> vector<6x6xf32>
    %36 = arith.addf %35, %5 : vector<6x6xf32>
    %cst_14 = arith.constant dense<0xFF800000> : vector<6xf32>
    %37 = vector.multi_reduction <maximumf>, %36, %cst_14 [1] : vector<6x6xf32> to vector<6xf32>
    %38 = vector.shape_cast %37 : vector<6xf32> to vector<6x1xf32>
    %39 = vector.broadcast %38 : vector<6x1xf32> to vector<6x6xf32>
    %40 = arith.subf %36, %39 : vector<6x6xf32>
    %41 = math.exp %40 : vector<6x6xf32>
    %cst_15 = arith.constant dense<0.000000e+00> : vector<6xf32>
    %42 = vector.multi_reduction <add>, %41, %cst_15 [1] : vector<6x6xf32> to vector<6xf32>
    %43 = vector.shape_cast %42 : vector<6xf32> to vector<6x1xf32>
    %44 = tpu.reciprocal %43 {approx = true} : vector<6x1xf32> -> vector<6x1xf32>
    %45 = vector.broadcast %44 : vector<6x1xf32> to vector<6x6xf32>
    %46 = arith.mulf %41, %45 : vector<6x6xf32>
    %cst_16 = arith.constant dense<0.000000e+00> : vector<6x8xf32>
    %47 = tpu.matmul %46, %34, %cst_16 {dimension_numbers = #tpu.dot_dimension_numbers<[1], [0], [0], [1], [0, 0, 1, 1], [], []>} : vector<6x6xf32>, vector<6x8xf32>, vector<6x8xf32> -> vector<6x8xf32>
    %c32 = arith.constant 32 : index
    %c0_17 = arith.constant 0 : index
    %48 = vector.load %arg1[%c32, %c0_17] : memref<182x96xf32, #tpu.memory_space<vmem>>, vector<8x24xf32>
    %cst_18 = arith.constant dense<0.000000e+00> : vector<6x24xf32>
    %49 = tpu.matmul %47, %48, %cst_18 {dimension_numbers = #tpu.dot_dimension_numbers<[1], [0], [0], [1], [0, 0, 1, 1], [], []>} : vector<6x8xf32>, vector<8x24xf32>, vector<6x24xf32> -> vector<6x24xf32>
    %50 = arith.addf %31, %49 : vector<6x24xf32>
    %51 = vector.extract_strided_slice %13 {offsets = [0, 16], sizes = [6, 8], strides = [1, 1]} : vector<6x72xf32> to vector<6x8xf32>
    %52 = vector.extract_strided_slice %13 {offsets = [0, 40], sizes = [6, 8], strides = [1, 1]} : vector<6x72xf32> to vector<6x8xf32>
    %53 = vector.extract_strided_slice %13 {offsets = [0, 64], sizes = [6, 8], strides = [1, 1]} : vector<6x72xf32> to vector<6x8xf32>
    %cst_19 = arith.constant dense<0.000000e+00> : vector<6x6xf32>
    %54 = tpu.matmul %51, %52, %cst_19 {dimension_numbers = #tpu.dot_dimension_numbers<[1], [1], [0], [0], [0, 0, 1, 0], [], []>} : vector<6x8xf32>, vector<6x8xf32>, vector<6x6xf32> -> vector<6x6xf32>
    %55 = arith.addf %54, %5 : vector<6x6xf32>
    %cst_20 = arith.constant dense<0xFF800000> : vector<6xf32>
    %56 = vector.multi_reduction <maximumf>, %55, %cst_20 [1] : vector<6x6xf32> to vector<6xf32>
    %57 = vector.shape_cast %56 : vector<6xf32> to vector<6x1xf32>
    %58 = vector.broadcast %57 : vector<6x1xf32> to vector<6x6xf32>
    %59 = arith.subf %55, %58 : vector<6x6xf32>
    %60 = math.exp %59 : vector<6x6xf32>
    %cst_21 = arith.constant dense<0.000000e+00> : vector<6xf32>
    %61 = vector.multi_reduction <add>, %60, %cst_21 [1] : vector<6x6xf32> to vector<6xf32>
    %62 = vector.shape_cast %61 : vector<6xf32> to vector<6x1xf32>
    %63 = tpu.reciprocal %62 {approx = true} : vector<6x1xf32> -> vector<6x1xf32>
    %64 = vector.broadcast %63 : vector<6x1xf32> to vector<6x6xf32>
    %65 = arith.mulf %60, %64 : vector<6x6xf32>
    %cst_22 = arith.constant dense<0.000000e+00> : vector<6x8xf32>
    %66 = tpu.matmul %65, %53, %cst_22 {dimension_numbers = #tpu.dot_dimension_numbers<[1], [0], [0], [1], [0, 0, 1, 1], [], []>} : vector<6x6xf32>, vector<6x8xf32>, vector<6x8xf32> -> vector<6x8xf32>
    %c40 = arith.constant 40 : index
    %c0_23 = arith.constant 0 : index
    %67 = vector.load %arg1[%c40, %c0_23] : memref<182x96xf32, #tpu.memory_space<vmem>>, vector<8x24xf32>
    %cst_24 = arith.constant dense<0.000000e+00> : vector<6x24xf32>
    %68 = tpu.matmul %66, %67, %cst_24 {dimension_numbers = #tpu.dot_dimension_numbers<[1], [0], [0], [1], [0, 0, 1, 1], [], []>} : vector<6x8xf32>, vector<8x24xf32>, vector<6x24xf32> -> vector<6x24xf32>
    %69 = arith.addf %50, %68 : vector<6x24xf32>
    %70 = vector.broadcast %6 : vector<1x24xf32> to vector<6x24xf32>
    %71 = arith.addf %69, %70 : vector<6x24xf32>
    %72 = arith.addf %0, %71 : vector<6x24xf32>
    %cst_25 = arith.constant dense<0.000000e+00> : vector<6xf32>
    %73 = vector.multi_reduction <add>, %72, %cst_25 [1] : vector<6x24xf32> to vector<6xf32>
    %74 = vector.shape_cast %73 : vector<6xf32> to vector<6x1xf32>
    %cst_26 = arith.constant 2.400000e+01 : f32
    %75 = vector.broadcast %cst_26 : f32 to vector<6x1xf32>
    %76 = arith.divf %74, %75 : vector<6x1xf32>
    %77 = vector.broadcast %76 : vector<6x1xf32> to vector<6x24xf32>
    %78 = arith.subf %72, %77 : vector<6x24xf32>
    %79 = arith.mulf %78, %78 : vector<6x24xf32>
    %cst_27 = arith.constant dense<0.000000e+00> : vector<6xf32>
    %80 = vector.multi_reduction <add>, %79, %cst_27 [1] : vector<6x24xf32> to vector<6xf32>
    %81 = vector.shape_cast %80 : vector<6xf32> to vector<6x1xf32>
    %cst_28 = arith.constant 2.400000e+01 : f32
    %82 = vector.broadcast %cst_28 : f32 to vector<6x1xf32>
    %83 = arith.divf %81, %82 : vector<6x1xf32>
    %84 = vector.broadcast %76 : vector<6x1xf32> to vector<6x24xf32>
    %85 = arith.subf %72, %84 : vector<6x24xf32>
    %cst_29 = arith.constant 9.99999974E-6 : f32
    %86 = vector.broadcast %cst_29 : f32 to vector<6x1xf32>
    %87 = arith.addf %83, %86 : vector<6x1xf32>
    %88 = math.rsqrt %87 : vector<6x1xf32>
    %89 = vector.broadcast %88 : vector<6x1xf32> to vector<6x24xf32>
    %90 = arith.mulf %85, %89 : vector<6x24xf32>
    %91 = vector.broadcast %7 : vector<1x24xf32> to vector<6x24xf32>
    %92 = arith.mulf %90, %91 : vector<6x24xf32>
    %93 = vector.broadcast %8 : vector<1x24xf32> to vector<6x24xf32>
    %94 = arith.addf %92, %93 : vector<6x24xf32>
    %cst_30 = arith.constant dense<0.000000e+00> : vector<6x96xf32>
    %95 = tpu.matmul %94, %2, %cst_30 {dimension_numbers = #tpu.dot_dimension_numbers<[1], [0], [0], [1], [0, 0, 1, 1], [], []>} : vector<6x24xf32>, vector<24x96xf32>, vector<6x96xf32> -> vector<6x96xf32>
    %96 = vector.broadcast %12 : vector<1x96xf32> to vector<6x96xf32>
    %97 = arith.addf %95, %96 : vector<6x96xf32>
    %cst_31 = arith.constant 0.000000e+00 : f32
    %98 = vector.broadcast %cst_31 : f32 to vector<6x96xf32>
    %99 = arith.maximumf %97, %98 : vector<6x96xf32>
    %cst_32 = arith.constant dense<0.000000e+00> : vector<6x24xf32>
    %100 = tpu.matmul %99, %3, %cst_32 {dimension_numbers = #tpu.dot_dimension_numbers<[1], [0], [0], [1], [0, 0, 1, 1], [], []>} : vector<6x96xf32>, vector<96x24xf32>, vector<6x24xf32> -> vector<6x24xf32>
    %101 = vector.broadcast %9 : vector<1x24xf32> to vector<6x24xf32>
    %102 = arith.addf %100, %101 : vector<6x24xf32>
    %103 = arith.addf %94, %102 : vector<6x24xf32>
    %cst_33 = arith.constant dense<0.000000e+00> : vector<6xf32>
    %104 = vector.multi_reduction <add>, %103, %cst_33 [1] : vector<6x24xf32> to vector<6xf32>
    %105 = vector.shape_cast %104 : vector<6xf32> to vector<6x1xf32>
    %cst_34 = arith.constant 2.400000e+01 : f32
    %106 = vector.broadcast %cst_34 : f32 to vector<6x1xf32>
    %107 = arith.divf %105, %106 : vector<6x1xf32>
    %108 = vector.broadcast %107 : vector<6x1xf32> to vector<6x24xf32>
    %109 = arith.subf %103, %108 : vector<6x24xf32>
    %110 = arith.mulf %109, %109 : vector<6x24xf32>
    %cst_35 = arith.constant dense<0.000000e+00> : vector<6xf32>
    %111 = vector.multi_reduction <add>, %110, %cst_35 [1] : vector<6x24xf32> to vector<6xf32>
    %112 = vector.shape_cast %111 : vector<6xf32> to vector<6x1xf32>
    %cst_36 = arith.constant 2.400000e+01 : f32
    %113 = vector.broadcast %cst_36 : f32 to vector<6x1xf32>
    %114 = arith.divf %112, %113 : vector<6x1xf32>
    %115 = vector.broadcast %107 : vector<6x1xf32> to vector<6x24xf32>
    %116 = arith.subf %103, %115 : vector<6x24xf32>
    %cst_37 = arith.constant 9.99999974E-6 : f32
    %117 = vector.broadcast %cst_37 : f32 to vector<6x1xf32>
    %118 = arith.addf %114, %117 : vector<6x1xf32>
    %119 = math.rsqrt %118 : vector<6x1xf32>
    %120 = vector.broadcast %119 : vector<6x1xf32> to vector<6x24xf32>
    %121 = arith.mulf %116, %120 : vector<6x24xf32>
    %122 = vector.broadcast %10 : vector<1x24xf32> to vector<6x24xf32>
    %123 = arith.mulf %121, %122 : vector<6x24xf32>
    %124 = vector.broadcast %11 : vector<1x24xf32> to vector<6x24xf32>
    %125 = arith.addf %123, %124 : vector<6x24xf32>
    %c0_38 = arith.constant 0 : index
    %c0_39 = arith.constant 0 : index
    %126 = vector.load %arg2[%c0_38, %c0_39] : memref<6x24xf32, #tpu.memory_space<vmem>>, vector<6x24xf32>
    tpu.vector_store %arg2[%c0_38, %c0_39], %125 {strides = array<i32>} : memref<6x24xf32, #tpu.memory_space<vmem>>, vector<6x24xf32>,
    return
  }
}

</mosaic_0001>

<bundles_post_ra>
// kernel: tpu_custom_call.1
= control target key start
LH: loop header
LB: loop body
LE: loop exit
PB: predicated region body
PF: predicated region fallthrough
CT: control target
= control target key end

     0   :  { %7 = vsyncpa [#allocation3], 0  ;;  %s715_s0 = inlined_call_operand.hbm [shape: f32[6,24], index: 0, kind: input, shape index: {}]   ;;  %s716_s1 = inlined_call_operand.hbm [shape: f32[182,96], index: 1, kind: input, shape index: {}]   ;;  %s717_s2 = inlined_call_operand.hbm [shape: f32[6,24], index: 2, kind: output, shape index: {}]  }
   0x1   :  { %8 = vsyncpa [#allocation6], 0 }
   0x2   :  { %9 = vsyncpa [#allocation4], 0  ;;  %s15_s11 = sshll.u32 %s715_s0, 4  ;;  %s622_s12 = smov [#allocation2]   ;;  %s16_s11 = int_to_ptr.hbm [resolvable:$true] %s15_s11 }
   0x3   :  { %s17_s13 = sshll.u32 %s622_s12, 4  ;;  %s25_s16 = sshll.u32 %s716_s1, 4  ;;  %s18_s13 = int_to_ptr.vmem [resolvable:$true] %s17_s13  ;;  %s26_s16 = int_to_ptr.hbm [resolvable:$true] %s25_s16 }
   0x4   :  { %20 = dma.hbm_to_vmem [thread:$0]  %s16_s11, 128, %s18_s13, [#allocation3]  }
   0x5   :  { %s623_s17 = smov [#allocation5]   ;;  %s624_s19 = smov 128  }
   0x6   :  { %s27_s18 = sshll.u32 %s623_s17, 4  ;;  %s625_s20 = smov 8   ;;  %s28_s18 = int_to_ptr.vmem [resolvable:$true] %s27_s18 }
   0x7   :  { %33 = dma.hbm_to_vmem [thread:$0]  %s26_s16, 2944, %s28_s18, [#allocation6], %s624_s19, %s624_s19, %s625_s20  }
   0x8   :  { %616 = dma.done.wait [#allocation3], 128  }
   0x9   :  { %617 = vsyncadd [#allocation3], 4294967168 }
   0xa   :  { %618 = dma.done.wait [#allocation6], 2944  }
   0xb   :  { %619 = vsyncadd [#allocation6], 4294964352  ;;  %v45_v0 = vld [vmem:[#allocation5 + $0x10] sm:$0xff]  ;;  %v44_v1 = vld [vmem:[#allocation5 + $0x8] sm:$0xff]  ;;  %vm63_vm0 = vcmask 195584   ;;  %s626_s0 = smov 112  }
   0xc   :  { %80 = vmatpush.msra.mxu2 %v45_v0  ;;  %v43_v2 = vld [vmem:[#allocation5] sm:$0xff]  ;;  %v657_v3 = vld [vmem:[#allocation2] sm:$0x3f]  ;;  %s627_s1 = smov 104   ;;  %s628_s21 = smov 96   ;;  %vm90_vm1 = vcmask 64512  }
   0xd   :  { %s629_s22 = smov 88   ;;  %s630_s23 = smov 120   ;;  %v62_v10 = vld [vmem:[#allocation5 + $0xb0] sm:$0x3f]  ;;  %vm115_vm2 = vcmask 46080   ;;  %vm133_vm3 = vcmask 1045504  }
   0xe   :  { %81 = vmatpush.msra.mxu2 %v44_v1  ;;  %s631_s24 = smov 72   ;;  %s632_s25 = smov 64   ;;  %vm129_vm4 = vcmask 48128   ;;  %v156_v47 = vld [vmem:[#allocation5 + $0x18] sm:$0xff]  ;;  %v223_v48 = vld [vmem:[#allocation5 + $0x20] sm:$0xff]  ;;  %v336_v49 = vld [vmem:[#allocation5 + $0x28] sm:$0xff] }
   0xf   :  { %s633_s26 = smov 80   ;;  %v690_v55 = vld [vmem:[#allocation5 + $0xa8] sm:$0xff]  ;;  %vm364_vm5 = vcmask 193536   ;;  %v634_v63 = vmov 24.0   ;;  %vm424_vm10 = vcmask 785408   ;;  %s635_s27 = smov [#allocation7]  }
  0x10   :  { %82 = vmatpush.msra.mxu2 %v43_v2  ;;  %v361_v57 = vperm.slane %v690_v55, 0  ;;  %s481_s28 = sshll.u32 %s635_s27, 4  ;;  %s483_s3 = sshll.u32 %s717_s2, 4  ;;  %s482_s28 = int_to_ptr.vmem [resolvable:$true] %s481_s28  ;;  %s484_s3 = int_to_ptr.hbm [resolvable:$true] %s483_s3 }
  0x11   :  { %494 = vmatmul.msk.f32.vlgmr.msra.gmra.mxu2 %vm63_vm0, %v657_v3 }
  0x94   :  { %v661_v4 = vpop.f32.mrf.mxu2 }
  0x95   :  { %270 = vrot.lane.b32.xlu2 %v661_v4, %s626_s0  ;;  %88 = vrot.lane.b32.xlu1 %v661_v4, %s627_s1 }
  0x96   :  { %159 = vrot.lane.b32.xlu0 %v661_v4, %s628_s21 }
  0x9d   :  { %272 = vrot.lane.b32.xlu1 %v661_v4, %s629_s22 }
  0x9e   :  { %157 = vrot.lane.b32.xlu0 %v661_v4, %s630_s23 }
  0xef   :  { %v271_v9 = vpop.permute.xlu2 %270 }
 0x107   :  { %v89_v5 = vpop.permute.xlu1 %88 }
 0x108   :  { %v160_v6 = vpop.permute.xlu0 %159  ;;  %495 = vmatpush.xpose.msk.msra.mxu1 %vm90_vm1, %v89_v5 }
 0x109   :  { %499 = vmatpush.xpose.msk.msra.mxu3 %vm90_vm1, %v160_v6 }
 0x10b   :  { %496 = vmatmul.msk.f32.vlgmr.msra.gmra.mxu1 %vm90_vm1, %v661_v4 }
 0x10d   :  { %265 = vmatpush.msrb.mxu3 %v156_v47 }
 0x10f   :  { %v273_v7 = vpop.permute.xlu1 %272 }
 0x110   :  { %v158_v8 = vpop.permute.xlu0 %157  ;;  %505 = vmatpush.xpose.msk.msra.mxu0 %vm90_vm1, %v273_v7 }
 0x111   :  { %500 = vmatmul.msk.f32.vlgmr.msra.gmra.mxu3 %vm90_vm1, %v158_v8 }
 0x113   :  { %506 = vmatmul.msk.f32.vlgmr.msra.gmra.mxu0 %vm90_vm1, %v271_v9 }
 0x188   :  { %v112_v11 = vpop.f32.mrf.mxu1 }
 0x189   :  { %v113_v12 = vadd.f32 %v112_v11, %v62_v10  ;;  %v48_v11 = vld [vmem:[#allocation5 + $0x40] sm:$0xff] }
 0x18a   :  { %415 = vmatpush.msra.mxu3 %v48_v11 }
 0x18b   :  { %v116_v13 = vsel %vm115_vm2, %v113_v12, -inf }
 0x18c   :  { %117 = vmax.xlane.f32.xlu0 %v116_v13  ;;  %v46_v13 = vld [vmem:[#allocation5 + $0x30] sm:$0xff] }
 0x190   :  { %v295_v14 = vpop.f32.mrf.mxu0 }
 0x191   :  { %v296_v15 = vadd.f32 %v295_v14, %v62_v10  ;;  %v60_v14 = vld [vmem:[#allocation5 + $0xa0] sm:$0xff] }
 0x192   :  { %432 = vmatpush.msrb.mxu0 %v60_v14 }
 0x193   :  { %v298_v16 = vsel %vm115_vm2, %v296_v15, -inf }
 0x194   :  { %v182_v17 = vpop.f32.mrf.mxu3  ;;  %299 = vmax.xlane.f32.xlu1 %v298_v16  ;;  %v58_v16 = vld [vmem:[#allocation5 + $0x90] sm:$0xff] }
 0x195   :  { %v183_v18 = vadd.f32 %v182_v17, %v62_v10 }
 0x197   :  { %v185_v19 = vsel %vm115_vm2, %v183_v18, -inf }
 0x198   :  { %186 = vmax.xlane.f32.xlu2 %v185_v19  ;;  %v57_v19 = vld [vmem:[#allocation5 + $0x88] sm:$0xff] }
 0x1ad   :  { %196 = vrot.lane.b32.xlu1 %v661_v4, %s631_s24 }
 0x1ff   :  { %v118_v20 = vpop.xlane.xlu0 %117 }
 0x200   :  { %v119_v21 = vsub.f32 %v113_v12, %v118_v20  ;;  %v47_v12 = vld [vmem:[#allocation5 + $0x38] sm:$0xff] }
 0x201   :  { %416 = vmatpush.msra.mxu3 %v47_v12 }
 0x202   :  { %v120_v22 = vmul.f32 1.442695, %v119_v21  ;;  %v56_v21 = vld [vmem:[#allocation5 + $0x80] sm:$0xff] }
 0x203   :  { %417 = vmatpush.msra.mxu3 %v46_v13 }
 0x204   :  { %526 = vpow2.f32 %v120_v22  ;;  %v55_v22 = vld [vmem:[#allocation5 + $0x78] sm:$0xff] }
 0x207   :  { %v300_v23 = vpop.xlane.xlu1 %299 }
 0x208   :  { %v301_v24 = vsub.f32 %v296_v15, %v300_v23  ;;  %v59_v15 = vld [vmem:[#allocation5 + $0x98] sm:$0xff]  ;;  %v54_v23 = vld [vmem:[#allocation5 + $0x70] sm:$0xff] }
 0x209   :  { %433 = vmatpush.msrb.mxu0 %v59_v15 }
 0x20a   :  { %v527_v25 = vpop.eup %526  ;;  %v302_v26 = vmul.f32 1.442695, %v301_v24  ;;  %v53_v24 = vld [vmem:[#allocation5 + $0x68] sm:$0xff] }
 0x20b   :  { %v187_v27 = vpop.xlane.xlu2 %186  ;;  %v122_v28 = vsel %vm115_vm2, %v527_v25, 0.0  ;;  %434 = vmatpush.msrb.mxu0 %v58_v16 }
 0x20c   :  { %528 = vpow2.f32 %v302_v26  ;;  %v188_v29 = vsub.f32 %v183_v18, %v187_v27  ;;  %123 = vadd.xlane.f32.xlu2 %v122_v28  ;;  %v52_v26 = vld [vmem:[#allocation5 + $0x60] sm:$0xff] }
 0x20d   :  { %435 = vmatpush.msrb.mxu0 %v57_v19 }
 0x20e   :  { %v189_v30 = vmul.f32 1.442695, %v188_v29 }
 0x20f   :  { %436 = vmatpush.msrb.mxu0 %v56_v21 }
 0x210   :  { %530 = vpow2.f32 %v189_v30 }
 0x211   :  { %437 = vmatpush.msrb.mxu0 %v55_v22 }
 0x212   :  { %v529_v31 = vpop.eup %528 }
 0x213   :  { %v304_v32 = vsel %vm115_vm2, %v529_v31, 0.0  ;;  %438 = vmatpush.msrb.mxu0 %v54_v23 }
 0x214   :  { %305 = vadd.xlane.f32.xlu0 %v304_v32  ;;  %v394_v32 = vperm.slane %v690_v55, 1 }
 0x215   :  { %439 = vmatpush.msrb.mxu0 %v53_v24 }
 0x216   :  { %v531_v33 = vpop.eup %530 }
 0x217   :  { %v191_v34 = vsel %vm115_vm2, %v531_v33, 0.0  ;;  %440 = vmatpush.msrb.mxu0 %v52_v26 }
 0x218   :  { %192 = vadd.xlane.f32.xlu2 %v191_v34 }
 0x21f   :  { %v197_v35 = vpop.permute.xlu1 %196 }
 0x220   :  { %501 = vmatpush.msk.msrb.mxu2 %vm133_vm3, %v197_v35  ;;  %v396_v35 = vperm.slane %v690_v55, 2 }
 0x228   :  { %309 = vrot.lane.b32.xlu0 %v661_v4, %s632_s25 }
 0x230   :  { %127 = vrot.lane.b32.xlu2 %v661_v4, %s633_s26 }
 0x27f   :  { %v124_v36 = vpop.xlane.xlu2 %123 }
 0x280   :  { %532 = vrcp.f32 %v124_v36 }
 0x286   :  { %v533_v39 = vpop.eup %532 }
 0x287   :  { %v306_v38 = vpop.xlane.xlu0 %305  ;;  %v126_v42 = vmul.f32 %v533_v39, %v527_v25  ;;  %v50_v39 = vld [vmem:[#allocation5 + $0x50] sm:$0xff] }
 0x28b   :  { %v193_v37 = vpop.xlane.xlu2 %192 }
 0x28c   :  { %534 = vrcp.f32 %v193_v37 }
 0x28d   :  { %536 = vrcp.f32 %v306_v38  ;;  %v51_v38 = vld [vmem:[#allocation5 + $0x58] sm:$0xff] }
 0x28e   :  { %538 = vrcp.f32 %v634_v63  ;;  %441 = vmatpush.msrb.mxu0 %v51_v38 }
 0x290   :  { %442 = vmatpush.msrb.mxu0 %v50_v39 }
 0x292   :  { %v535_v40 = vpop.eup %534 }
 0x293   :  { %v128_v41 = vpop.permute.xlu2 %127  ;;  %v195_v43 = vmul.f32 %v535_v40, %v531_v33  ;;  %v537_v44 = vpop.eup %536  ;;  %v49_v40 = vld [vmem:[#allocation5 + $0x48] sm:$0xff] }
 0x294   :  { %497 = vmatpush.msk.msrb.mxu1 %vm133_vm3, %v128_v41  ;;  %v308_v46 = vmul.f32 %v537_v44, %v529_v31  ;;  %v539_v0 = vpop.eup %538  ;;  %443 = vmatpush.msrb.mxu0 %v49_v40  ;;  %v398_v41 = vperm.slane %v690_v55, 6 }
 0x295   :  { %498 = vmatmul.msk.f32.vlgmr.msrb.gmra.mxu1 %vm129_vm4, %v126_v42  ;;  %502 = vmatmul.msk.f32.vlgmr.msrb.gmra.mxu2 %vm129_vm4, %v195_v43  ;;  %v369_v1 = vmul.f32 24.0, %v539_v0  ;;  %vm373_vm6 = vweird.f32 %v539_v0 }
 0x296   :  { %242 = vmatpush.msra.mxu1 %v223_v48 }
 0x297   :  { %v370_v2 = vsub.f32 1.0, %v369_v1  ;;  %v471_v1 = vperm.slane %v690_v55, 4 }
 0x298   :  { %355 = vmatpush.msrb.mxu1 %v336_v49 }
 0x299   :  { %v371_v4 = vmul.f32 %v539_v0, %v370_v2 }
 0x29a   :  { %v310_v45 = vpop.permute.xlu0 %309 }
 0x29b   :  { %507 = vmatpush.msk.msra.mxu2 %vm133_vm3, %v310_v45  ;;  %v372_v5 = vadd.f32 %v539_v0, %v371_v4  ;;  %v423_v45 = vperm.slane %v690_v55, 3 }
 0x29d   :  { %508 = vmatmul.msk.f32.vlgmr.msra.gmra.mxu2 %vm129_vm4, %v308_v46  ;;  %v695_v6 = vsel %vm373_vm6, %v539_v0, %v372_v5  ;;  %v473_v5 = vperm.slane %v690_v55, 5 }
 0x312   :  { %v153_v50 = vpop.f32.mrf.mxu1 }
 0x313   :  { %504 = vmatmul.msk.f32.vlgmr.msrb.gmra.mxu3 %vm90_vm1, %v153_v50 }
 0x318   :  { %v220_v51 = vpop.f32.mrf.mxu2 }
 0x319   :  { %503 = vmatmul.msk.f32.vlgmr.msra.gmra.mxu1 %vm90_vm1, %v220_v51 }
 0x320   :  { %v333_v52 = vpop.f32.mrf.mxu2 }
 0x321   :  { %509 = vmatmul.msk.f32.vlgmr.msrb.gmra.mxu1 %vm90_vm1, %v333_v52 }
 0x396   :  { %v244_v53 = vpop.f32.mrf.mxu1  ;;  %v267_v54 = vpop.f32.mrf.mxu3 }
 0x397   :  { %v268_v56 = vadd.f32 %v267_v54, %v244_v53 }
 0x39e   :  { %v357_v58 = vpop.f32.mrf.mxu1 }
 0x39f   :  { %v360_v59 = vadd.f32 %v357_v58, %v268_v56 }
 0x3a1   :  { %v362_v60 = vadd.f32 %v361_v57, %v360_v59 }
 0x3a3   :  { %v363_v61 = vadd.f32 %v362_v60, %v657_v3 }
 0x3a5   :  { %v365_v62 = vsel %vm364_vm5, %v363_v61, 0.0 }
 0x3a6   :  { %366 = vadd.xlane.f32.xlu1 %v365_v62 }
 0x419   :  { %v367_v7 = vpop.xlane.xlu1 %366 }
 0x41a   :  { %v375_v8 = vmul.f32 %v695_v6, %v367_v7 }
 0x41c   :  { %v376_v9 = vsub.f32 %v363_v61, %v375_v8 }
 0x41e   :  { %v377_v10 = vmul.f32 %v376_v9, %v376_v9 }
 0x420   :  { %v378_v3 = vsel %vm364_vm5, %v377_v10, 0.0 }
 0x421   :  { %379 = vadd.xlane.f32.xlu0 %v378_v3 }
 0x494   :  { %v380_v17 = vpop.xlane.xlu0 %379 }
 0x495   :  { %v381_v18 = vmul.f32 %v380_v17, %v695_v6 }
 0x497   :  { %v382_v20 = vadd.f32 1e-05, %v381_v18 }
 0x499   :  { %540 = vrsqrt.f32 %v382_v20  ;;  %vm389_vm8 = vweird.f32 %v382_v20 }
 0x49f   :  { %v541_v25 = vpop.eup %540 }
 0x4a0   :  { %v384_v27 = vmul.f32 %v541_v25, %v382_v20  ;;  %vm390_vm7 = vweird.f32 %v541_v25 }
 0x4a1   :  { %vm391_vm9 = vmor %vm389_vm8, %vm390_vm7 }
 0x4a2   :  { %v385_v28 = vmul.f32 %v541_v25, %v384_v27 }
 0x4a4   :  { %v386_v29 = vmul.f32 0.5, %v385_v28 }
 0x4a6   :  { %v387_v30 = vsub.f32 1.5, %v386_v29 }
 0x4a8   :  { %v388_v31 = vmul.f32 %v541_v25, %v387_v30 }
 0x4aa   :  { %v392_v33 = vsel %vm391_vm9, %v541_v25, %v388_v31 }
 0x4ab   :  { %v393_v34 = vmul.f32 %v392_v33, %v376_v9 }
 0x4ad   :  { %v395_v36 = vmul.f32 %v394_v32, %v393_v34 }
 0x4af   :  { %v397_v37 = vadd.f32 %v396_v35, %v395_v36 }
 0x4b1   :  { %510 = vmatmul.msk.f32.vlgmr.msra.gmra.mxu3 %vm63_vm0, %v397_v37 }
 0x534   :  { %v419_v42 = vpop.f32.mrf.mxu3 }
 0x535   :  { %v420_v43 = vadd.f32 %v419_v42, %v398_v41 }
 0x537   :  { %v422_v44 = vmax.f32 %v420_v43, 0.0 }
 0x539   :  { %511 = vmatmul.msk.f32.vlgmr.msrb.gmra.mxu0 %vm424_vm10, %v422_v44 }
 0x5b6   :  { %v445_v46 = vpop.f32.mrf.mxu0 }
 0x5b7   :  { %v446_v47 = vadd.f32 %v445_v46, %v423_v45 }
 0x5b9   :  { %v448_v48 = vadd.f32 %v446_v47, %v397_v37 }
 0x5bb   :  { %v449_v49 = vsel %vm364_vm5, %v448_v48, 0.0 }
 0x5bc   :  { %450 = vadd.xlane.f32.xlu2 %v449_v49 }
 0x62f   :  { %v451_v50 = vpop.xlane.xlu2 %450 }
 0x630   :  { %v452_v51 = vmul.f32 %v451_v50, %v695_v6 }
 0x632   :  { %v453_v52 = vsub.f32 %v448_v48, %v452_v51 }
 0x634   :  { %v454_v53 = vmul.f32 %v453_v52, %v453_v52 }
 0x636   :  { %v455_v54 = vsel %vm364_vm5, %v454_v53, 0.0 }
 0x637   :  { %456 = vadd.xlane.f32.xlu1 %v455_v54 }
 0x6aa   :  { %v457_v56 = vpop.xlane.xlu1 %456 }
 0x6ab   :  { %v458_v57 = vmul.f32 %v457_v56, %v695_v6 }
 0x6ad   :  { %v459_v58 = vadd.f32 1e-05, %v458_v57 }
 0x6af   :  { %542 = vrsqrt.f32 %v459_v58  ;;  %vm466_vm12 = vweird.f32 %v459_v58 }
 0x6b5   :  { %v543_v59 = vpop.eup %542 }
 0x6b6   :  { %v461_v60 = vmul.f32 %v543_v59, %v459_v58  ;;  %vm467_vm11 = vweird.f32 %v543_v59 }
 0x6b7   :  { %vm468_vm13 = vmor %vm466_vm12, %vm467_vm11 }
 0x6b8   :  { %v462_v61 = vmul.f32 %v543_v59, %v461_v60 }
 0x6ba   :  { %v463_v62 = vmul.f32 0.5, %v462_v61 }
 0x6bc   :  { %v464_v63 = vsub.f32 1.5, %v463_v62 }
 0x6be   :  { %v465_v0 = vmul.f32 %v543_v59, %v464_v63 }
 0x6c0   :  { %v469_v2 = vsel %vm468_vm13, %v543_v59, %v465_v0 }
 0x6c1   :  { %v470_v4 = vmul.f32 %v469_v2, %v453_v52 }
 0x6c3   :  { %v472_v6 = vmul.f32 %v471_v1, %v470_v4 }
 0x6c5   :  { %v474_v7 = vadd.f32 %v473_v5, %v472_v6 }
 0x6c7   :  { %475 = vst.msk [vmem:[#allocation7] sm:$0x3f] %vm364_vm5, %v474_v7 }
 0x6c8   :  { %486 = dma.vmem_to_hbm [thread:$0]  %s482_s28, 128, %s484_s3, [#allocation4]  }
 0x6c9   :  { %620 = dma.done.wait [#allocation4], 128  }
 0x6ca   :  { %621 = vsyncadd [#allocation4], 4294967168 }
 0x6cb   :  { %491 = vsyncpa [#allocation3], 1 }
 0x6cc   :  { %492 = vsyncpa [#allocation6], 1 }
 0x6cd   :  { %493 = vsyncpa [#allocation4], 1 }

</bundles_post_ra>
